<compile_context>
chip_gen: v7x
topology: tpu7x:2x2x1
jax: 0.10.0
libtpu: 0.0.40
codegen_flags: <defaults>
</compile_context>

<pallas_src>
import jax
import jax.numpy as jnp
from jax.experimental import pallas as pl
from jax.experimental.pallas import tpu as pltpu

LANE = 128


def _round_up(n, m):
    return ((n + m - 1) // m) * m


def _dual_tensorcore():
    """True on chips with 2 TensorCores per JAX device (v4 megacore, v7x)."""
    try:
        kind = jax.devices()[0].device_kind.lower()
    except Exception:
        return False
    return ("v7" in kind) or ("v4" in kind)


# ---------------------------------------------------------------------------
# Fused kernel: one grid step per batch block; everything is MXU matmuls.
# ---------------------------------------------------------------------------
def _fused_kernel(patch_ref, pool_ref, w_ref, b_ref, wh2_ref, bh2_ref,
                  wo_ref, bo_ref, out_ref, hid_ref):
    # patch_ref: (bblk, S, KP)  bf16 lane-dense im2col patches (KP = pad(9*Cin, 128))
    # pool_ref:  (bblk, bblk*S) f32 block-diagonal mean-pool matrix (1/(H*W) folded in)
    # w_ref:     (KP, CP) bf16  conv weights, im2col row order (ky, kx, cin)
    # b_ref:     (1, CP)  f32   conv bias
    # wh2_ref:   (CP, HP) bf16  folded hidden weights (wh @ wh)
    # bh2_ref:   (1, HP)  f32   folded hidden bias (bh @ wh + bh)
    # wo_ref:    (HP, OP) bf16, bo_ref: (1, OP) f32   output layer
    # out_ref:   (1, bblk, OP) f32, hid_ref: (1, bblk, HP) f32
    bblk, S, KP = patch_ref.shape

    # 3x3 SAME conv of the whole block as ONE lane-dense MXU matmul
    # (bf16 x bf16 operands, f32 accumulation).
    p2d = patch_ref[...].reshape(bblk * S, KP)          # merge leading dims (free)
    acc = jnp.dot(p2d, w_ref[...], preferred_element_type=jnp.float32)
    acc = jnp.maximum(acc + b_ref[...], 0.0)            # conv bias + ReLU

    # Global average pool as an MXU matmul (block-diagonal ones/(H*W) rows):
    # keeps the 256-row reduction off the VPU/XLU slots, scale pre-folded.
    feat = jnp.dot(pool_ref[...], acc, preferred_element_type=jnp.float32)

    # Head: fc (== hidden_layer) applied twice, pre-folded offline into (wh2, bh2).
    h = jnp.dot(feat.astype(wh2_ref.dtype), wh2_ref[...],
                preferred_element_type=jnp.float32) + bh2_ref[...]
    h = jnp.maximum(h, 0.0)                              # hidden activation (ReLU)
    # TODO(synk): nn.Dropout is stochastic; hidden_dropout == 0.0 so the
    # `if self.hidden_dropout > 0` branch is never taken, exactly as in the module.
    hid_ref[...] = h.reshape(1, bblk, -1)

    out = jnp.dot(h.astype(wo_ref.dtype), wo_ref[...],
                  preferred_element_type=jnp.float32) + bo_ref[...]
    out_ref[...] = out.reshape(1, bblk, -1)


# ---------------------------------------------------------------------------
# One-time (static) weight transforms.
# ---------------------------------------------------------------------------
def prepare_params(params):
    """im2col-reshape conv weights, fold the double hidden_layer application,
    zero-pad feature dims to 128-lane multiples, cast weights to bf16."""
    conv_w = params["conv_w"].astype(jnp.float32)   # (3, 3, Cin, Cf)  HWIO
    conv_b = params["conv_b"].astype(jnp.float32)   # (1, Cf)
    wh = params["wh"].astype(jnp.float32)           # (Cf, Hd)   (in, out) = torch W.T
    bh = params["bh"].astype(jnp.float32)           # (1, Hd)
    wo = params["wo"].astype(jnp.float32)           # (Hd, Od)
    bo = params["bo"].astype(jnp.float32)           # (1, Od)

    Cin, Cf = conv_w.shape[2], conv_w.shape[3]
    Hd, Od = wh.shape[1], wo.shape[1]
    # TODO(synk): at real Inception feature dims (>=192) round these to 256 on
    # v6e/v7x (2x256x256 MXU); 128 is already the minimum pad for the toy 32/3.
    KP = _round_up(9 * Cin, LANE)
    CP = _round_up(Cf, LANE)
    HP = _round_up(Hd, LANE)
    OP = _round_up(Od, LANE)

    # conv weights in im2col row order (ky outer, kx, cin inner) to match patches
    w = jnp.pad(conv_w.reshape(9 * Cin, Cf), ((0, KP - 9 * Cin), (0, CP - Cf)))
    b = jnp.pad(conv_b, ((0, 0), (0, CP - Cf)))

    # forward: h = (f @ wh + bh) @ wh + bh = f @ (wh @ wh) + (bh @ wh + bh)
    # (fold valid only because nothing nonlinear sits between the two applications)
    wh2 = jnp.dot(wh, wh, preferred_element_type=jnp.float32)
    bh2 = jnp.dot(bh, wh, preferred_element_type=jnp.float32) + bh
    wh2 = jnp.pad(wh2, ((0, CP - Cf), (0, HP - Hd)))
    bh2 = jnp.pad(bh2, ((0, 0), (0, HP - Hd)))
    wo_p = jnp.pad(wo, ((0, HP - Hd), (0, OP - Od)))
    bo_p = jnp.pad(bo, ((0, 0), (0, OP - Od)))

    # bf16 weights (half DMA/VMEM, MXU-native); biases stay f32 (added post-matmul).
    return {"w": w.astype(jnp.bfloat16), "b": b,
            "wh2": wh2.astype(jnp.bfloat16), "bh2": bh2,
            "wo": wo_p.astype(jnp.bfloat16), "bo": bo_p,
            "dims": (Hd, Od), "KP": KP}


# ---------------------------------------------------------------------------
# Wrapper-side layout plumbing: NCHW -> lane-dense bf16 im2col patch slab.
# ---------------------------------------------------------------------------
def _im2col_patches(x_nchw, KP):
    """The SAME-pad halo and the 9-tap gather ride along the NCHW->NHWC copy
    that the wrapper already does (layout plumbing, no compute hoisted), so the
    kernel's input DMA is fully lane-dense and needs no VMEM halo scratch or
    lane-unaligned in-kernel concatenate."""
    x = jnp.transpose(x_nchw, (0, 2, 3, 1)).astype(jnp.float32)      # NHWC
    B, H, W, Cin = x.shape
    xp = jnp.pad(x, ((0, 0), (1, 1), (1, 1), (0, 0)))                # halo = 1
    taps = [xp[:, ky:ky + H, kx:kx + W, :]
            for ky in range(3) for kx in range(3)]                   # (ky, kx, cin) order
    p = jnp.concatenate(taps, axis=-1)                               # (B, H, W, 9*Cin)
    p = jnp.pad(p, ((0, 0), (0, 0), (0, 0), (0, KP - 9 * Cin)))
    return p.reshape(B, H * W, KP).astype(jnp.bfloat16), (B, H, W)


# ---------------------------------------------------------------------------
# Full inception_model forward (single fused pallas_call).
# ---------------------------------------------------------------------------
def inception_model_forward(x_nchw, prep, *, max_bblk=8):
    Hd, Od = prep["dims"]
    KP = prep["KP"]
    w, b = prep["w"], prep["b"]
    wh2, bh2 = prep["wh2"], prep["bh2"]
    wo, bo = prep["wo"], prep["bo"]
    CP, HP, OP = w.shape[1], wh2.shape[1], wo.shape[1]

    patches, (B, H, W) = _im2col_patches(x_nchw, KP)
    S = H * W

    # Batch blocking: >= 2 grid steps on dual-TensorCore chips (v4 / v7x) so the
    # "parallel" axis actually shards across cores; single big block on v5e/v6e.
    min_steps = 2 if (_dual_tensorcore() and B >= 2) else 1
    bblk = max(1, min(max_bblk, -(-B // min_steps)))
    G = -(-B // bblk)
    Bp = G * bblk
    if Bp != B:                                   # pad awkward batch sizes (no bblk=1 cliff)
        patches = jnp.pad(patches, ((0, Bp - B), (0, 0), (0, 0)))

    # Block-diagonal mean-pool matrix (1/(H*W) folded in) -> pooling runs on MXU.
    pool = jnp.kron(jnp.eye(bblk, dtype=jnp.float32),
                    jnp.full((1, S), 1.0 / S, dtype=jnp.float32))    # (bblk, bblk*S)

    # TODO(synk): at real Inception shapes (299x299, Cout>=192) add a spatial
    # row-block "arbitrary" grid axis with a partial-sum pool accumulator, size
    # the row tile against per-generation VMEM (v7x: 64 MiB phys / 32 MiB scoped
    # default vs 128 MiB on v5e/v6e) via vmem_limit_bytes, and put
    # pipeline_mode=pl.Buffered(1) on the grid-invariant weight specs to drop
    # their second resident copy.  Negligible at these toy sizes.
    out_pad, hid_pad = pl.pallas_call(
        _fused_kernel,
        out_shape=(jax.ShapeDtypeStruct((G, bblk, OP), jnp.float32),
                   jax.ShapeDtypeStruct((G, bblk, HP), jnp.float32)),
        grid=(G,),
        in_specs=[
            pl.BlockSpec((bblk, S, KP), lambda i: (i, 0, 0)),        # patches (lane-dense)
            pl.BlockSpec((bblk, bblk * S), lambda i: (0, 0)),        # pool matrix (invariant)
            pl.BlockSpec(w.shape, lambda i: (0, 0)),
            pl.BlockSpec(b.shape, lambda i: (0, 0)),
            pl.BlockSpec(wh2.shape, lambda i: (0, 0)),
            pl.BlockSpec(bh2.shape, lambda i: (0, 0)),
            pl.BlockSpec(wo.shape, lambda i: (0, 0)),
            pl.BlockSpec(bo.shape, lambda i: (0, 0)),
        ],
        out_specs=(pl.BlockSpec((1, bblk, OP), lambda i: (i, 0, 0)),
                   pl.BlockSpec((1, bblk, HP), lambda i: (i, 0, 0))),
        compiler_params=pltpu.CompilerParams(
            dimension_semantics=("parallel",)),
    )(patches, pool, w, b, wh2, bh2, wo, bo)

    # Undo batch padding and slice the 128-lane feature padding back off.
    out = out_pad.reshape(Bp, OP)[:B, :Od]
    hid = hid_pad.reshape(Bp, HP)[:B, :Hd]
    return out, hid


# ---------------------------------------------------------------------------
# Pure-JAX f32 reference (independent path) for a correctness check.
# ---------------------------------------------------------------------------
def _reference_forward(x_nchw, params):
    x = jnp.transpose(x_nchw, (0, 2, 3, 1)).astype(jnp.float32)
    y = jax.lax.conv_general_dilated(
        x, params["conv_w"], window_strides=(1, 1), padding="SAME",
        dimension_numbers=("NHWC", "HWIO", "NHWC"))
    y = jnp.maximum(y + params["conv_b"].reshape(1, 1, 1, -1), 0.0)
    feat = jnp.mean(y, axis=(1, 2))
    h = feat @ params["wh"] + params["bh"]        # backbone fc == hidden_layer
    h = h @ params["wh"] + params["bh"]           # hidden_layer applied again
    h = jnp.maximum(h, 0.0)
    out = h @ params["wo"] + params["bo"]
    return out, h


if __name__ == "__main__":
    B, Cin, H, W = 2, 4, 16, 16
    in_features = 32        # backbone feature dim (== pretrain_model.fc.in_features)
    hidden_units = 32       # must equal in_features (hidden_layer applied twice)
    output_units = 3

    key = jax.random.PRNGKey(0)
    ks = jax.random.split(key, 7)

    x = jax.random.normal(ks[0], (B, Cin, H, W), jnp.float32)
    params = {
        "conv_w": 0.1 * jax.random.normal(ks[1], (3, 3, Cin, in_features), jnp.float32),
        "conv_b": 0.1 * jax.random.normal(ks[2], (1, in_features), jnp.float32),
        "wh":     0.1 * jax.random.normal(ks[3], (in_features, hidden_units), jnp.float32),
        "bh":     0.1 * jax.random.normal(ks[4], (1, hidden_units), jnp.float32),
        "wo":     0.1 * jax.random.normal(ks[5], (hidden_units, output_units), jnp.float32),
        "bo":     0.1 * jax.random.normal(ks[6], (1, output_units), jnp.float32),
    }

    prep = prepare_params(params)               # one-time static weight prep
    outputs, hidden = inception_model_forward(x, prep)
    jax.block_until_ready((outputs, hidden))

    assert outputs.shape == (B, output_units)
    assert hidden.shape == (B, hidden_units)

    ref_out, ref_hid = _reference_forward(x, params)
    jax.block_until_ready((ref_out, ref_hid))
    assert float(jnp.max(jnp.abs(outputs - ref_out))) < 1e-2
    assert float(jnp.max(jnp.abs(hidden - ref_hid))) < 1e-2

    print("KERNEL_OK")
</pallas_src>

<mosaic_0001>
module attributes {stable_mosaic.version = 11 : i64} {
  func.func @_fused_kernel(%arg0: i32, %arg1: memref<2x256x128xbf16, #tpu.memory_space<vmem>>, %arg2: memref<2x512xf32, #tpu.memory_space<vmem>>, %arg3: memref<128x128xbf16, #tpu.memory_space<vmem>>, %arg4: memref<1x128xf32, #tpu.memory_space<vmem>>, %arg5: memref<128x128xbf16, #tpu.memory_space<vmem>>, %arg6: memref<1x128xf32, #tpu.memory_space<vmem>>, %arg7: memref<128x128xbf16, #tpu.memory_space<vmem>>, %arg8: memref<1x128xf32, #tpu.memory_space<vmem>>, %arg9: memref<1x2x128xf32, #tpu.memory_space<vmem>>, %arg10: memref<1x2x128xf32, #tpu.memory_space<vmem>>) attributes {dimension_semantics = [#tpu.dimension_semantics<parallel>], iteration_bounds = array<i64: 1>, scalar_prefetch = 0 : i64, scratch_operands = 0 : i64, tpu.core_type = #tpu.core_type<tc>, window_params = [{transform_indices = @transform_0, window_bounds = array<i64: 2, 256, 128>}, {pipeline_mode = #tpu.pipeline_mode<synchronous>, transform_indices = @transform_1, window_bounds = array<i64: 2, 512>}, {pipeline_mode = #tpu.pipeline_mode<synchronous>, transform_indices = @transform_2, window_bounds = array<i64: 128, 128>}, {pipeline_mode = #tpu.pipeline_mode<synchronous>, transform_indices = @transform_3, window_bounds = array<i64: 1, 128>}, {pipeline_mode = #tpu.pipeline_mode<synchronous>, transform_indices = @transform_4, window_bounds = array<i64: 128, 128>}, {pipeline_mode = #tpu.pipeline_mode<synchronous>, transform_indices = @transform_5, window_bounds = array<i64: 1, 128>}, {pipeline_mode = #tpu.pipeline_mode<synchronous>, transform_indices = @transform_6, window_bounds = array<i64: 128, 128>}, {pipeline_mode = #tpu.pipeline_mode<synchronous>, transform_indices = @transform_7, window_bounds = array<i64: 1, 128>}, {transform_indices = @transform_8, window_bounds = array<i64: 1, 2, 128>}, {transform_indices = @transform_9, window_bounds = array<i64: 1, 2, 128>}]} {
    %c0 = arith.constant 0 : index
    %c0_0 = arith.constant 0 : index
    %c0_1 = arith.constant 0 : index
    %0 = vector.load %arg1[%c0, %c0_0, %c0_1] : memref<2x256x128xbf16, #tpu.memory_space<vmem>>, vector<2x256x128xbf16>
    %1 = vector.shape_cast %0 : vector<2x256x128xbf16> to vector<512x128xbf16>
    %c0_2 = arith.constant 0 : index
    %c0_3 = arith.constant 0 : index
    %2 = vector.load %arg3[%c0_2, %c0_3] : memref<128x128xbf16, #tpu.memory_space<vmem>>, vector<128x128xbf16>
    %cst = arith.constant dense<0.000000e+00> : vector<512x128xf32>
    %3 = tpu.matmul %1, %2, %cst {dimension_numbers = #tpu.dot_dimension_numbers<[1], [0], [0], [1], [0, 0, 1, 1], [], []>} : vector<512x128xbf16>, vector<128x128xbf16>, vector<512x128xf32> -> vector<512x128xf32>
    %c0_4 = arith.constant 0 : index
    %c0_5 = arith.constant 0 : index
    %4 = vector.load %arg4[%c0_4, %c0_5] : memref<1x128xf32, #tpu.memory_space<vmem>>, vector<1x128xf32>
    %5 = vector.broadcast %4 : vector<1x128xf32> to vector<512x128xf32>
    %6 = arith.addf %3, %5 : vector<512x128xf32>
    %cst_6 = arith.constant 0.000000e+00 : f32
    %7 = vector.broadcast %cst_6 : f32 to vector<512x128xf32>
    %8 = arith.maximumf %6, %7 : vector<512x128xf32>
    %c0_7 = arith.constant 0 : index
    %c0_8 = arith.constant 0 : index
    %9 = vector.load %arg2[%c0_7, %c0_8] : memref<2x512xf32, #tpu.memory_space<vmem>>, vector<2x512xf32>
    %cst_9 = arith.constant dense<0.000000e+00> : vector<2x128xf32>
    %10 = tpu.matmul %9, %8, %cst_9 {dimension_numbers = #tpu.dot_dimension_numbers<[1], [0], [0], [1], [0, 0, 1, 1], [], []>} : vector<2x512xf32>, vector<512x128xf32>, vector<2x128xf32> -> vector<2x128xf32>
    %11 = arith.truncf %10 : vector<2x128xf32> to vector<2x128xbf16>
    %c0_10 = arith.constant 0 : index
    %c0_11 = arith.constant 0 : index
    %12 = vector.load %arg5[%c0_10, %c0_11] : memref<128x128xbf16, #tpu.memory_space<vmem>>, vector<128x128xbf16>
    %cst_12 = arith.constant dense<0.000000e+00> : vector<2x128xf32>
    %13 = tpu.matmul %11, %12, %cst_12 {dimension_numbers = #tpu.dot_dimension_numbers<[1], [0], [0], [1], [0, 0, 1, 1], [], []>} : vector<2x128xbf16>, vector<128x128xbf16>, vector<2x128xf32> -> vector<2x128xf32>
    %c0_13 = arith.constant 0 : index
    %c0_14 = arith.constant 0 : index
    %14 = vector.load %arg6[%c0_13, %c0_14] : memref<1x128xf32, #tpu.memory_space<vmem>>, vector<1x128xf32>
    %15 = vector.broadcast %14 : vector<1x128xf32> to vector<2x128xf32>
    %16 = arith.addf %13, %15 : vector<2x128xf32>
    %cst_15 = arith.constant 0.000000e+00 : f32
    %17 = vector.broadcast %cst_15 : f32 to vector<2x128xf32>
    %18 = arith.maximumf %16, %17 : vector<2x128xf32>
    %19 = vector.shape_cast %18 : vector<2x128xf32> to vector<1x2x128xf32>
    %c0_16 = arith.constant 0 : index
    %c0_17 = arith.constant 0 : index
    %c0_18 = arith.constant 0 : index
    %20 = vector.load %arg10[%c0_16, %c0_17, %c0_18] : memref<1x2x128xf32, #tpu.memory_space<vmem>>, vector<1x2x128xf32>
    tpu.vector_store %arg10[%c0_16, %c0_17, %c0_18], %19 {strides = array<i32>} : memref<1x2x128xf32, #tpu.memory_space<vmem>>, vector<1x2x128xf32>,
    %21 = arith.truncf %18 : vector<2x128xf32> to vector<2x128xbf16>
    %c0_19 = arith.constant 0 : index
    %c0_20 = arith.constant 0 : index
    %22 = vector.load %arg7[%c0_19, %c0_20] : memref<128x128xbf16, #tpu.memory_space<vmem>>, vector<128x128xbf16>
    %cst_21 = arith.constant dense<0.000000e+00> : vector<2x128xf32>
    %23 = tpu.matmul %21, %22, %cst_21 {dimension_numbers = #tpu.dot_dimension_numbers<[1], [0], [0], [1], [0, 0, 1, 1], [], []>} : vector<2x128xbf16>, vector<128x128xbf16>, vector<2x128xf32> -> vector<2x128xf32>
    %c0_22 = arith.constant 0 : index
    %c0_23 = arith.constant 0 : index
    %24 = vector.load %arg8[%c0_22, %c0_23] : memref<1x128xf32, #tpu.memory_space<vmem>>, vector<1x128xf32>
    %25 = vector.broadcast %24 : vector<1x128xf32> to vector<2x128xf32>
    %26 = arith.addf %23, %25 : vector<2x128xf32>
    %27 = vector.shape_cast %26 : vector<2x128xf32> to vector<1x2x128xf32>
    %c0_24 = arith.constant 0 : index
    %c0_25 = arith.constant 0 : index
    %c0_26 = arith.constant 0 : index
    %28 = vector.load %arg9[%c0_24, %c0_25, %c0_26] : memref<1x2x128xf32, #tpu.memory_space<vmem>>, vector<1x2x128xf32>
    tpu.vector_store %arg9[%c0_24, %c0_25, %c0_26], %27 {strides = array<i32>} : memref<1x2x128xf32, #tpu.memory_space<vmem>>, vector<1x2x128xf32>,
    return
  }
  func.func @transform_0(%arg0: i32) -> (i32, i32, i32) {
    %c0_i32 = arith.constant 0 : i32
    %c0_i32_0 = arith.constant 0 : i32
    %c0_i32_1 = arith.constant 0 : i32
    return %arg0, %c0_i32, %c0_i32_0 : i32, i32, i32
  }
  func.func @transform_1(%arg0: i32) -> (i32, i32) {
    %c0_i32 = arith.constant 0 : i32
    %c0_i32_0 = arith.constant 0 : i32
    %c0_i32_1 = arith.constant 0 : i32
    return %c0_i32, %c0_i32_0 : i32, i32
  }
  func.func @transform_2(%arg0: i32) -> (i32, i32) {
    %c0_i32 = arith.constant 0 : i32
    %c0_i32_0 = arith.constant 0 : i32
    %c0_i32_1 = arith.constant 0 : i32
    return %c0_i32, %c0_i32_0 : i32, i32
  }
  func.func @transform_3(%arg0: i32) -> (i32, i32) {
    %c0_i32 = arith.constant 0 : i32
    %c0_i32_0 = arith.constant 0 : i32
    %c0_i32_1 = arith.constant 0 : i32
    return %c0_i32, %c0_i32_0 : i32, i32
  }
  func.func @transform_4(%arg0: i32) -> (i32, i32) {
    %c0_i32 = arith.constant 0 : i32
    %c0_i32_0 = arith.constant 0 : i32
    %c0_i32_1 = arith.constant 0 : i32
    return %c0_i32, %c0_i32_0 : i32, i32
  }
  func.func @transform_5(%arg0: i32) -> (i32, i32) {
    %c0_i32 = arith.constant 0 : i32
    %c0_i32_0 = arith.constant 0 : i32
    %c0_i32_1 = arith.constant 0 : i32
    return %c0_i32, %c0_i32_0 : i32, i32
  }
  func.func @transform_6(%arg0: i32) -> (i32, i32) {
    %c0_i32 = arith.constant 0 : i32
    %c0_i32_0 = arith.constant 0 : i32
    %c0_i32_1 = arith.constant 0 : i32
    return %c0_i32, %c0_i32_0 : i32, i32
  }
  func.func @transform_7(%arg0: i32) -> (i32, i32) {
    %c0_i32 = arith.constant 0 : i32
    %c0_i32_0 = arith.constant 0 : i32
    %c0_i32_1 = arith.constant 0 : i32
    return %c0_i32, %c0_i32_0 : i32, i32
  }
  func.func @transform_8(%arg0: i32) -> (i32, i32, i32) {
    %c0_i32 = arith.constant 0 : i32
    %c0_i32_0 = arith.constant 0 : i32
    %c0_i32_1 = arith.constant 0 : i32
    return %arg0, %c0_i32, %c0_i32_0 : i32, i32, i32
  }
  func.func @transform_9(%arg0: i32) -> (i32, i32, i32) {
    %c0_i32 = arith.constant 0 : i32
    %c0_i32_0 = arith.constant 0 : i32
    %c0_i32_1 = arith.constant 0 : i32
    return %arg0, %c0_i32, %c0_i32_0 : i32, i32, i32
  }
}

</mosaic_0001>

<bundles_post_ra>
// kernel: tpu_custom_call.1
= control target key start
LH: loop header
LB: loop body
LE: loop exit
PB: predicated region body
PF: predicated region fallthrough
CT: control target
= control target key end

     0   :  { %15 = vsyncpa [#allocation3], 0  ;;  %s2096_s0 = inlined_call_operand.hbm [shape: bf16[2,256,128], index: 0, kind: input, shape index: {}]   ;;  %s2097_s1 = inlined_call_operand.hbm [shape: f32[2,512], index: 1, kind: input, shape index: {}]   ;;  %s2098_s2 = inlined_call_operand.hbm [shape: bf16[128,128], index: 2, kind: input, shape index: {}]   ;;  %s2099_s3 = inlined_call_operand.vmem [shape: f32[1,128], index: 3, kind: input, shape index: {}]   ;;  %s2100_s4 = inlined_call_operand.hbm [shape: bf16[128,128], index: 4, kind: input, shape index: {}]   ;;  %s2101_s5 = inlined_call_operand.vmem [shape: f32[1,128], index: 5, kind: input, shape index: {}]   ;;  %s2102_s6 = inlined_call_operand.hbm [shape: bf16[128,128], index: 6, kind: input, shape index: {}]   ;;  %s2103_s7 = inlined_call_operand.vmem [shape: f32[1,128], index: 7, kind: input, shape index: {}]   ;;  %s2104_s8 = inlined_call_operand.hbm [shape: f32[1,2,128], index: 8, kind: output, shape index: {0}]   ;;  %s2105_s9 = inlined_call_operand.hbm [shape: f32[1,2,128], index: 9, kind: output, shape index: {1}]  }
   0x1   :  { %16 = vsyncpa [#allocation6], 0 }
   0x2   :  { %17 = vsyncpa [#allocation9], 0 }
   0x3   :  { %18 = vsyncpa [#allocation4], 0 }
   0x4   :  { %19 = vsyncpa [#allocation13], 0  ;;  %s1805_s30 = smov [#allocation5]   ;;  %s1641_s13 = scalar_lea.hbm %s2097_s1, 128 }
   0x5   :  { %s38_s10 = sshll.u32 %s1805_s30, 4  ;;  %p1642_p0 = scmp.ne.s32.totalorder %s2097_s1, %s1641_s13  ;;  %s39_s10 = int_to_ptr.vmem [resolvable:$true] %s38_s10 }
   0x6   :  { %p1645_p1 = scmp.lt.u32.totalorder %s1641_s13, %s2097_s1 }
   0x8   :  { %p1647_p2 = pnand %p1645_p1, %p1642_p0 }
   0xa   :  { %1650 = shalt.err (!%p1647_p2)
}
   0xb   :  { %s1651_s18 = scalar_lea.vmem %s39_s10, 128  ;;  %p1656_p4 = scmp.lt.s32.totalorder %s39_s10, %s39_s10 }
   0xc   :  { %p1652_p3 = scmp.ne.s32.totalorder %s39_s10, %s1651_s18  ;;  %p1657_p5 = scmp.lt.s32.totalorder %s1651_s18, %s1651_s18 }
   0xe   :  { %p1658_p6 = por %p1657_p5, %p1656_p4 }
  0x10   :  { %p1659_p7 = pnand %p1658_p6, %p1652_p3 }
  0x12   :  { %1662 = shalt.err (!%p1659_p7)
}
  0x13   :  { %41 = dma.hbm_to_vmem [thread:$0]  %s2097_s1, 128, %s39_s10, [#allocation6]  }
  0x14   :  { %s1806_s21 = smov [#allocation8]   ;;  %s1807_s23 = smov [#allocation2]  }
  0x15   :  { %s61_s22 = sshll.u32 %s1806_s21, 4  ;;  %s25_s24 = sshll.u32 %s1807_s23, 4  ;;  %s62_s22 = int_to_ptr.vmem [resolvable:$true] %s61_s22  ;;  %s26_s24 = int_to_ptr.vmem [resolvable:$true] %s25_s24 }
  0x16   :  { %s1663_s27 = scalar_lea.hbm %s2100_s4, 1024 }
  0x17   :  { %p1664_p8 = scmp.ne.s32.totalorder %s2100_s4, %s1663_s27  ;;  %p1667_p9 = scmp.lt.u32.totalorder %s1663_s27, %s2100_s4 }
  0x19   :  { %p1669_p10 = pnand %p1667_p9, %p1664_p8 }
  0x1b   :  { %1672 = shalt.err (!%p1669_p10)
}
  0x1c   :  { %s1673_s1 = scalar_lea.vmem %s62_s22, 1024  ;;  %p1678_p12 = scmp.lt.s32.totalorder %s62_s22, %s62_s22 }
  0x1d   :  { %p1674_p11 = scmp.ne.s32.totalorder %s62_s22, %s1673_s1  ;;  %p1679_p13 = scmp.lt.s32.totalorder %s1673_s1, %s1673_s1 }
  0x1f   :  { %p1680_p0 = por %p1679_p13, %p1678_p12 }
  0x21   :  { %p1681_p1 = pnand %p1680_p0, %p1674_p11 }
  0x23   :  { %1684 = shalt.err (!%p1681_p1)
}
  0x24   :  { %s1808_s10 = smov 64   ;;  %s1809_s12 = smov 4  }
  0x25   :  { %67 = dma.hbm_to_vmem [thread:$0]  %s2100_s4, 1024, %s62_s22, [#allocation9], %s1808_s10, %s1808_s10, %s1809_s12  }
  0x26   :  { %s1685_s17 = scalar_lea.hbm %s2096_s0, 4096 }
  0x27   :  { %p1686_p2 = scmp.ne.s32.totalorder %s2096_s0, %s1685_s17  ;;  %p1689_p3 = scmp.lt.u32.totalorder %s1685_s17, %s2096_s0 }
  0x29   :  { %p1691_p4 = pnand %p1689_p3, %p1686_p2 }
  0x2b   :  { %1694 = shalt.err (!%p1691_p4)
}
  0x2c   :  { %s1695_s23 = scalar_lea.vmem %s26_s24, 4096  ;;  %p1700_p6 = scmp.lt.s32.totalorder %s26_s24, %s26_s24 }
  0x2d   :  { %p1696_p5 = scmp.ne.s32.totalorder %s26_s24, %s1695_s23  ;;  %p1701_p7 = scmp.lt.s32.totalorder %s1695_s23, %s1695_s23 }
  0x2f   :  { %p1702_p8 = por %p1701_p7, %p1700_p6 }
  0x31   :  { %p1703_p9 = pnand %p1702_p8, %p1696_p5 }
  0x33   :  { %1706 = shalt.err (!%p1703_p9)
}
  0x34   :  { %31 = dma.hbm_to_vmem [thread:$0]  %s2096_s0, 4096, %s26_s24, [#allocation3], %s1808_s10, %s1808_s10, %s1809_s12  }
  0x35   :  { %s1810_s25 = smov [#allocation7]   ;;  %s1811_s27 = smov [#allocation10]  }
  0x36   :  { %s47_s26 = sshll.u32 %s1810_s25, 4  ;;  %s75_s28 = sshll.u32 %s1811_s27, 4  ;;  %s48_s26 = int_to_ptr.vmem [resolvable:$true] %s47_s26  ;;  %s76_s28 = int_to_ptr.vmem [resolvable:$true] %s75_s28 }
  0x37   :  { %s1707_s11 = scalar_lea.hbm %s2098_s2, 1024 }
  0x38   :  { %p1708_p10 = scmp.ne.s32.totalorder %s2098_s2, %s1707_s11  ;;  %p1711_p11 = scmp.lt.u32.totalorder %s1707_s11, %s2098_s2 }
  0x3a   :  { %p1713_p12 = pnand %p1711_p11, %p1708_p10 }
  0x3c   :  { %1716 = shalt.err (!%p1713_p12)
}
  0x3d   :  { %s1717_s0 = scalar_lea.vmem %s48_s26, 1024  ;;  %p1722_p0 = scmp.lt.s32.totalorder %s48_s26, %s48_s26 }
  0x3e   :  { %p1718_p13 = scmp.ne.s32.totalorder %s48_s26, %s1717_s0  ;;  %p1723_p1 = scmp.lt.s32.totalorder %s1717_s0, %s1717_s0 }
  0x40   :  { %p1724_p2 = por %p1723_p1, %p1722_p0 }
  0x42   :  { %p1725_p3 = pnand %p1724_p2, %p1718_p13 }
  0x44   :  { %1728 = shalt.err (!%p1725_p3)
}
  0x45   :  { %53 = dma.hbm_to_vmem [thread:$0]  %s2098_s2, 1024, %s48_s26, [#allocation6], %s1808_s10, %s1808_s10, %s1809_s12  }
  0x46   :  { %s1729_s19 = scalar_lea.hbm %s2102_s6, 1024 }
  0x47   :  { %p1730_p4 = scmp.ne.s32.totalorder %s2102_s6, %s1729_s19  ;;  %p1733_p5 = scmp.lt.u32.totalorder %s1729_s19, %s2102_s6 }
  0x49   :  { %p1735_p6 = pnand %p1733_p5, %p1730_p4 }
  0x4b   :  { %1738 = shalt.err (!%p1735_p6)
}
  0x4c   :  { %s1739_s22 = scalar_lea.vmem %s76_s28, 1024  ;;  %p1744_p8 = scmp.lt.s32.totalorder %s76_s28, %s76_s28 }
  0x4d   :  { %p1740_p7 = scmp.ne.s32.totalorder %s76_s28, %s1739_s22  ;;  %p1745_p9 = scmp.lt.s32.totalorder %s1739_s22, %s1739_s22 }
  0x4f   :  { %p1746_p10 = por %p1745_p9, %p1744_p8 }
  0x51   :  { %p1747_p11 = pnand %p1746_p10, %p1740_p7 }
  0x53   :  { %1750 = shalt.err (!%p1747_p11)
}
  0x54   :  { %81 = dma.hbm_to_vmem [thread:$0]  %s2102_s6, 1024, %s76_s28, [#allocation9], %s1808_s10, %s1808_s10, %s1809_s12  }
  0x55   :  { %1795 = dma.done.wait [#allocation3], 4096  }
  0x56   :  { %1796 = vsyncadd [#allocation3], 4294963200 }
  0x57   :  { %1797 = dma.done.wait [#allocation6], 1152  }
  0x58   :  { %1798 = vsyncadd [#allocation6], 4294966144 }
  0x59   :  { %1799 = dma.done.wait [#allocation9], 2048  }
  0x5a   :  { %1800 = vsyncadd [#allocation9], 4294965248  ;;  %v1584_v0 = vld [vmem:[#allocation7] sm:$0xff]   ;;  %v1585_v1 = vld [vmem:[#allocation7 + $0x8] sm:$0xff]   ;;  %v1812_v40 = vmov 1983009808   ;;  %v786_v42 = vlaneseq }
  0x5b   :  { %1388 = vmatprep.subr.bf16.mxu0 %v1584_v0  ;;  %v1586_v2 = vld [vmem:[#allocation7 + $0x10] sm:$0xff]   ;;  %v1587_v3 = vld [vmem:[#allocation7 + $0x18] sm:$0xff]   ;;  %v1588_v5 = vld [vmem:[#allocation7 + $0x20] sm:$0xff]   ;;  %v784_v41 = vunpack.c.l.s4 %v1812_v40  ;;  %vm1814_vm0 = vmmov 0   ;;  %s1815_s26 = smov [#allocation12]  }
  0x5c   :  { %1389 = vmatpush3.bf16.msra.mxu0 %v1584_v0  ;;  %v1592_v4 = vld [vmem:[#allocation2] sm:$0xff]   ;;  %v1589_v6 = vld [vmem:[#allocation7 + $0x28] sm:$0xff]   ;;  %v1590_v7 = vld [vmem:[#allocation7 + $0x30] sm:$0xff]   ;;  %v787_v44 = vshrl.u32 %v786_v42, 7  ;;  %s1186_s27 = sshll.u32 %s1815_s26, 4  ;;  %s1187_s27 = int_to_ptr.vmem [resolvable:$true] %s1186_s27 }
  0x5d   :  { %1390 = vmatprep.subr.bf16.mxu0 %v1585_v1  ;;  %1404 = vmatprep.mubr.bf16.mxu0 %v1592_v4  ;;  %v1591_v8 = vld [vmem:[#allocation7 + $0x38] sm:$0xff]   ;;  %v1593_v9 = vld [vmem:[#allocation2 + $0x8] sm:$0xff]   ;;  %v1594_v10 = vld [vmem:[#allocation2 + $0x10] sm:$0xff]   ;;  %v785_v43 = vunpack.c.0.s8 %v784_v41  ;;  %s1751_s28 = scalar_lea.vmem %s1187_s27, 32  ;;  %p1756_p13 = scmp.lt.s32.totalorder %s1187_s27, %s1187_s27 }
  0x5e   :  { %v1595_v11 = vld [vmem:[#allocation2 + $0x18] sm:$0xff]   ;;  %v1596_v12 = vld [vmem:[#allocation2 + $0x20] sm:$0xff]   ;;  %v1597_v13 = vld [vmem:[#allocation2 + $0x28] sm:$0xff]   ;;  %p1752_p12 = scmp.ne.s32.totalorder %s1187_s27, %s1751_s28  ;;  %p1757_p0 = scmp.lt.s32.totalorder %s1751_s28, %s1751_s28 }
  0x5f   :  { %v1598_v14 = vld [vmem:[#allocation2 + $0x30] sm:$0xff]   ;;  %v1599_v15 = vld [vmem:[#allocation2 + $0x38] sm:$0xff]   ;;  %v1600_v16 = vld [vmem:[#allocation2 + $0x40] sm:$0xff]   ;;  %v788_v45 = vsub.s32 %v785_v43, %v787_v44 }
  0x60   :  { %1391 = vmatpush3.bf16.msra.mxu0 %v1585_v1  ;;  %v1601_v17 = vld [vmem:[#allocation2 + $0x48] sm:$0xff]   ;;  %v1602_v18 = vld [vmem:[#allocation2 + $0x50] sm:$0xff]   ;;  %v1603_v19 = vld [vmem:[#allocation2 + $0x58] sm:$0xff]   ;;  %p1758_p1 = por %p1757_p0, %p1756_p13 }
  0x61   :  { %1392 = vmatprep.subr.bf16.mxu0 %v1586_v2  ;;  %v1604_v20 = vld [vmem:[#allocation2 + $0x60] sm:$0xff]   ;;  %v1605_v21 = vld [vmem:[#allocation2 + $0x68] sm:$0xff]   ;;  %v1606_v22 = vld [vmem:[#allocation2 + $0x70] sm:$0xff]  }
  0x62   :  { %v1607_v23 = vld [vmem:[#allocation2 + $0x78] sm:$0xff]   ;;  %v1608_v24 = vld [vmem:[#allocation2 + $0x80] sm:$0xff]   ;;  %v1609_v25 = vld [vmem:[#allocation2 + $0x88] sm:$0xff]   ;;  %p1759_p2 = pnand %p1758_p1, %p1752_p12 }
  0x63   :  { %v1610_v26 = vld [vmem:[#allocation2 + $0x90] sm:$0xff]   ;;  %v1611_v27 = vld [vmem:[#allocation2 + $0x98] sm:$0xff]   ;;  %v1612_v28 = vld [vmem:[#allocation2 + $0xa0] sm:$0xff]  }
  0x64   :  { %1393 = vmatpush3.bf16.msra.mxu0 %v1586_v2  ;;  %v1613_v29 = vld [vmem:[#allocation2 + $0xa8] sm:$0xff]   ;;  %v1614_v30 = vld [vmem:[#allocation2 + $0xb0] sm:$0xff]   ;;  %v1615_v31 = vld [vmem:[#allocation2 + $0xb8] sm:$0xff]  }
  0x65   :  { %1394 = vmatprep.subr.bf16.mxu0 %v1587_v3  ;;  %v1616_v32 = vld [vmem:[#allocation2 + $0xc0] sm:$0xff]   ;;  %v1617_v33 = vld [vmem:[#allocation2 + $0xc8] sm:$0xff]   ;;  %v1618_v34 = vld [vmem:[#allocation2 + $0xd0] sm:$0xff]  }
  0x66   :  { %v1619_v35 = vld [vmem:[#allocation2 + $0xd8] sm:$0xff]   ;;  %v1620_v36 = vld [vmem:[#allocation2 + $0xe0] sm:$0xff]   ;;  %v1621_v37 = vld [vmem:[#allocation2 + $0xe8] sm:$0xff]  }
  0x67   :  { %v1622_v38 = vld [vmem:[#allocation2 + $0xf0] sm:$0xff]   ;;  %v1623_v39 = vld [vmem:[#allocation2 + $0xf8] sm:$0xff]   ;;  %v780_v46 = vld [vmem:[#allocation5] sm:$0xff] }
  0x68   :  { %1395 = vmatpush3.bf16.msra.mxu0 %v1587_v3  ;;  %v1939_v47 = vrot.slane %v780_v46, %v788_v45  ;;  %v1946_v49 = vld [vmem:[%s2099_s3] ss:$0 sm:$0xff]  ;;  %v782_v53 = vcombine.high %v780_v46, %v780_v46 }
  0x69   :  { %1396 = vmatprep.subr.bf16.mxu0 %v1588_v5 }
  0x6a   :  { %v797_v48 = vcombine.high %v1939_v47, %v1939_v47  ;;  %v1952_v61 = vrot.slane %v782_v53, %v788_v45 }
  0x6c   :  { %1397 = vmatpush3.bf16.msra.mxu0 %v1588_v5  ;;  %867 = vmatprep.mubr.f32.mxu1 %v797_v48 }
  0x6d   :  { %1398 = vmatprep.subr.bf16.mxu0 %v1589_v6 }
  0x70   :  { %1399 = vmatpush3.bf16.msra.mxu0 %v1589_v6 }
  0x71   :  { %1400 = vmatprep.subr.bf16.mxu0 %v1590_v7 }
  0x74   :  { %1401 = vmatpush3.bf16.msra.mxu0 %v1590_v7 }
  0x75   :  { %1402 = vmatprep.subr.bf16.mxu0 %v1591_v8 }
  0x78   :  { %1403 = vmatpush3.bf16.msra.mxu0 %v1591_v8 }
  0x7b   :  { %1405 = vmatmul.mubr.bf16.vlgmr.msra.gmra.mrb[0].mxu0 %v1593_v9 }
  0x7c   :  { %1408 = vmatprep.mubr.bf16.mxu0 %v1594_v10 }
  0x83   :  { %1409 = vmatmul.mubr.bf16.gmra.mrb[4].mxu0 %v1595_v11 }
  0x84   :  { %1412 = vmatprep.mubr.bf16.mxu0 %v1596_v12 }
  0x8b   :  { %1413 = vmatmul.mubr.bf16.gmra.mrb[8].mxu0 %v1597_v13 }
  0x8c   :  { %1416 = vmatprep.mubr.bf16.mxu0 %v1598_v14 }
  0x93   :  { %1417 = vmatmul.mubr.bf16.gmra.mrb[12].mxu0 %v1599_v15 }
  0x94   :  { %1420 = vmatprep.mubr.bf16.mxu0 %v1600_v16 }
  0x9b   :  { %1421 = vmatmul.mubr.bf16.gmra.mrb[16].mxu0 %v1601_v17 }
  0x9c   :  { %1424 = vmatprep.mubr.bf16.mxu0 %v1602_v18 }
  0xa3   :  { %1425 = vmatmul.mubr.bf16.gmra.mrb[20].mxu0 %v1603_v19 }
  0xa4   :  { %1428 = vmatprep.mubr.bf16.mxu0 %v1604_v20 }
  0xab   :  { %1429 = vmatmul.mubr.bf16.gmra.mrb[24].mxu0 %v1605_v21 }
  0xac   :  { %1432 = vmatprep.mubr.bf16.mxu0 %v1606_v22 }
  0xb3   :  { %1433 = vmatmul.mubr.bf16.gmra.mrb[28].mxu0 %v1607_v23 }
  0xb4   :  { %1436 = vmatprep.mubr.bf16.mxu0 %v1608_v24 }
  0xbb   :  { %1437 = vmatmul.mubr.bf16.gmra.mrb[32].mxu0 %v1609_v25 }
  0xbc   :  { %1440 = vmatprep.mubr.bf16.mxu0 %v1610_v26 }
  0xc3   :  { %1441 = vmatmul.mubr.bf16.gmra.mrb[36].mxu0 %v1611_v27 }
  0xc4   :  { %1444 = vmatprep.mubr.bf16.mxu0 %v1612_v28 }
  0xcb   :  { %1445 = vmatmul.mubr.bf16.gmra.mrb[40].mxu0 %v1613_v29 }
  0xcc   :  { %1448 = vmatprep.mubr.bf16.mxu0 %v1614_v30 }
  0xd3   :  { %1449 = vmatmul.mubr.bf16.gmra.mrb[44].mxu0 %v1615_v31 }
  0xd4   :  { %1452 = vmatprep.mubr.bf16.mxu0 %v1616_v32 }
  0xdb   :  { %1453 = vmatmul.mubr.bf16.gmra.mrb[48].mxu0 %v1617_v33 }
  0xdc   :  { %1456 = vmatprep.mubr.bf16.mxu0 %v1618_v34 }
  0xe3   :  { %1457 = vmatmul.mubr.bf16.gmra.mrb[52].mxu0 %v1619_v35 }
  0xe4   :  { %1460 = vmatprep.mubr.bf16.mxu0 %v1620_v36 }
  0xeb   :  { %1461 = vmatmul.mubr.bf16.gmra.mrb[56].mxu0 %v1621_v37 }
  0xec   :  { %1464 = vmatprep.mubr.bf16.mxu0 %v1622_v38 }
  0xf3   :  { %1465 = vmatmul.mubr.bf16.gmra.mrb[60].mxu0 %v1623_v39 }
 0x14e   :  { %v1406_v50 = vpop.f32.mrb[0].mxu0 }
 0x14f   :  { %v470_v51 = vadd.f32 %v1406_v50, %v1946_v49  ;;  %v461_v52 = vpop.f32.mrb[1].mxu0 }
 0x150   :  { %v462_v54 = vadd.f32 %v1946_v49, %v461_v52  ;;  %v1407_v55 = vpop.f32.mrb[2].mxu0 }
 0x151   :  { %v473_v56 = vadd.f32 %v1407_v55, %v1946_v49  ;;  %v464_v57 = vpop.f32.mrb[3].mxu0  ;;  %v718_v59 = vmax.f32 %v470_v51, 0.0 }
 0x152   :  { %v465_v58 = vadd.f32 %v1946_v49, %v464_v57  ;;  %v716_v62 = vmax.f32 %v462_v54, 0.0 }
 0x153   :  { %v719_v60 = vmax.f32 %v473_v56, 0.0 }
 0x154   :  { %v717_v63 = vmax.f32 %v465_v58, 0.0 }
 0x155   :  { %v1954_v0 = vpack.c.bf16 %v719_v60, %v718_v59 }
 0x156   :  { %v1410_v1 = vpop.f32.mrb[4].mxu0  ;;  %v1956_v2 = vpack.c.bf16 %v717_v63, %v716_v62 }
 0x157   :  { %v486_v3 = vadd.f32 %v1410_v1, %v1946_v49  ;;  %v477_v4 = vpop.f32.mrb[5].mxu0 }
 0x158   :  { %v478_v5 = vadd.f32 %v1946_v49, %v477_v4  ;;  %v1411_v6 = vpop.f32.mrb[6].mxu0 }
 0x159   :  { %v489_v7 = vadd.f32 %v1411_v6, %v1946_v49  ;;  %v480_v8 = vpop.f32.mrb[7].mxu0  ;;  %v722_v10 = vmax.f32 %v486_v3, 0.0 }
 0x15a   :  { %v481_v9 = vadd.f32 %v1946_v49, %v480_v8  ;;  %v720_v12 = vmax.f32 %v478_v5, 0.0 }
 0x15b   :  { %v723_v11 = vmax.f32 %v489_v7, 0.0 }
 0x15c   :  { %v721_v13 = vmax.f32 %v481_v9, 0.0 }
 0x15d   :  { %v1962_v14 = vpack.c.bf16 %v723_v11, %v722_v10 }
 0x15e   :  { %v1964_v15 = vpack.c.bf16 %v721_v13, %v720_v12  ;;  %v1414_v16 = vpop.f32.mrb[8].mxu0 }
 0x15f   :  { %v502_v17 = vadd.f32 %v1414_v16, %v1946_v49  ;;  %v493_v18 = vpop.f32.mrb[9].mxu0 }
 0x160   :  { %v494_v19 = vadd.f32 %v1946_v49, %v493_v18  ;;  %v1415_v20 = vpop.f32.mrb[10].mxu0 }
 0x161   :  { %v505_v21 = vadd.f32 %v1415_v20, %v1946_v49  ;;  %v496_v22 = vpop.f32.mrb[11].mxu0  ;;  %v726_v24 = vmax.f32 %v502_v17, 0.0 }
 0x162   :  { %v497_v23 = vadd.f32 %v1946_v49, %v496_v22  ;;  %v724_v26 = vmax.f32 %v494_v19, 0.0 }
 0x163   :  { %v727_v25 = vmax.f32 %v505_v21, 0.0 }
 0x164   :  { %v725_v27 = vmax.f32 %v497_v23, 0.0 }
 0x165   :  { %v1970_v28 = vpack.c.bf16 %v727_v25, %v726_v24 }
 0x166   :  { %v1972_v29 = vpack.c.bf16 %v725_v27, %v724_v26  ;;  %v1418_v30 = vpop.f32.mrb[12].mxu0 }
 0x167   :  { %v518_v31 = vadd.f32 %v1418_v30, %v1946_v49  ;;  %v509_v32 = vpop.f32.mrb[13].mxu0 }
 0x168   :  { %v510_v33 = vadd.f32 %v1946_v49, %v509_v32  ;;  %v1419_v34 = vpop.f32.mrb[14].mxu0 }
 0x169   :  { %v521_v35 = vadd.f32 %v1419_v34, %v1946_v49  ;;  %v512_v36 = vpop.f32.mrb[15].mxu0  ;;  %v730_v38 = vmax.f32 %v518_v31, 0.0 }
 0x16a   :  { %v513_v37 = vadd.f32 %v1946_v49, %v512_v36  ;;  %v728_v40 = vmax.f32 %v510_v33, 0.0 }
 0x16b   :  { %v731_v39 = vmax.f32 %v521_v35, 0.0 }
 0x16c   :  { %v729_v41 = vmax.f32 %v513_v37, 0.0 }
 0x16d   :  { %v1978_v42 = vpack.c.bf16 %v731_v39, %v730_v38 }
 0x16e   :  { %v1980_v43 = vpack.c.bf16 %v729_v41, %v728_v40  ;;  %v1422_v44 = vpop.f32.mrb[16].mxu0 }
 0x16f   :  { %v534_v45 = vadd.f32 %v1422_v44, %v1946_v49  ;;  %v525_v46 = vpop.f32.mrb[17].mxu0 }
 0x170   :  { %v526_v48 = vadd.f32 %v1946_v49, %v525_v46  ;;  %v1423_v50 = vpop.f32.mrb[18].mxu0 }
 0x171   :  { %v537_v51 = vadd.f32 %v1423_v50, %v1946_v49  ;;  %v528_v52 = vpop.f32.mrb[19].mxu0  ;;  %v734_v54 = vmax.f32 %v534_v45, 0.0 }
 0x172   :  { %v529_v53 = vadd.f32 %v1946_v49, %v528_v52  ;;  %v732_v56 = vmax.f32 %v526_v48, 0.0 }
 0x173   :  { %v735_v55 = vmax.f32 %v537_v51, 0.0 }
 0x174   :  { %v733_v57 = vmax.f32 %v529_v53, 0.0 }
 0x175   :  { %v1512_v58 = vpack.c.bf16 %v735_v55, %v734_v54 }
 0x176   :  { %v1426_v59 = vpop.f32.mrb[20].mxu0  ;;  %v1508_v60 = vpack.c.bf16 %v733_v57, %v732_v56  ;;  %v798_v56 = vcombine.high %v1952_v61, %v1952_v61 }
 0x177   :  { %v550_v62 = vadd.f32 %v1426_v59, %v1946_v49  ;;  %v541_v63 = vpop.f32.mrb[21].mxu0 }
 0x178   :  { %v542_v1 = vadd.f32 %v1946_v49, %v541_v63  ;;  %v1427_v3 = vpop.f32.mrb[22].mxu0  ;;  %1509 = vmatprep.subr.bf16.mxu1 %v1508_v60 }
 0x179   :  { %v553_v4 = vadd.f32 %v1427_v3, %v1946_v49  ;;  %v544_v5 = vpop.f32.mrb[23].mxu0  ;;  %1511 = vmatpush3.bf16.msra.mxu1 %v1956_v2  ;;  %v738_v7 = vmax.f32 %v550_v62, 0.0 }
 0x17a   :  { %v545_v6 = vadd.f32 %v1946_v49, %v544_v5  ;;  %1513 = vmatprep.subr.bf16.mxu1 %v1512_v58  ;;  %v736_v9 = vmax.f32 %v542_v1, 0.0 }
 0x17b   :  { %v739_v8 = vmax.f32 %v553_v4, 0.0 }
 0x17c   :  { %v737_v10 = vmax.f32 %v545_v6, 0.0 }
 0x17d   :  { %v1520_v11 = vpack.c.bf16 %v739_v8, %v738_v7  ;;  %1515 = vmatpush3.bf16.msra.mxu1 %v1954_v0 }
 0x17e   :  { %v1516_v12 = vpack.c.bf16 %v737_v10, %v736_v9  ;;  %v1430_v13 = vpop.f32.mrb[24].mxu0 }
 0x17f   :  { %v566_v16 = vadd.f32 %v1430_v13, %v1946_v49  ;;  %v557_v17 = vpop.f32.mrb[25].mxu0 }
 0x180   :  { %v558_v18 = vadd.f32 %v1946_v49, %v557_v17  ;;  %v1431_v19 = vpop.f32.mrb[26].mxu0  ;;  %1517 = vmatprep.subr.bf16.mxu1 %v1516_v12 }
 0x181   :  { %v569_v2 = vadd.f32 %v1431_v19, %v1946_v49  ;;  %v560_v20 = vpop.f32.mrb[27].mxu0  ;;  %1519 = vmatpush3.bf16.msra.mxu1 %v1964_v15  ;;  %v742_v22 = vmax.f32 %v566_v16, 0.0 }
 0x182   :  { %v561_v21 = vadd.f32 %v1946_v49, %v560_v20  ;;  %1521 = vmatprep.subr.bf16.mxu1 %v1520_v11  ;;  %v740_v0 = vmax.f32 %v558_v18, 0.0 }
 0x183   :  { %v743_v23 = vmax.f32 %v569_v2, 0.0 }
 0x184   :  { %v741_v24 = vmax.f32 %v561_v21, 0.0 }
 0x185   :  { %v1528_v25 = vpack.c.bf16 %v743_v23, %v742_v22  ;;  %1523 = vmatpush3.bf16.msra.mxu1 %v1962_v14 }
 0x186   :  { %v1524_v26 = vpack.c.bf16 %v741_v24, %v740_v0  ;;  %v1434_v27 = vpop.f32.mrb[28].mxu0 }
 0x187   :  { %v582_v30 = vadd.f32 %v1434_v27, %v1946_v49  ;;  %v573_v31 = vpop.f32.mrb[29].mxu0 }
 0x188   :  { %v574_v32 = vadd.f32 %v1946_v49, %v573_v31  ;;  %v1435_v33 = vpop.f32.mrb[30].mxu0  ;;  %1525 = vmatprep.subr.bf16.mxu1 %v1524_v26 }
 0x189   :  { %v585_v15 = vadd.f32 %v1435_v33, %v1946_v49  ;;  %v576_v34 = vpop.f32.mrb[31].mxu0  ;;  %1527 = vmatpush3.bf16.msra.mxu1 %v1972_v29  ;;  %v746_v36 = vmax.f32 %v582_v30, 0.0 }
 0x18a   :  { %v577_v35 = vadd.f32 %v1946_v49, %v576_v34  ;;  %1529 = vmatprep.subr.bf16.mxu1 %v1528_v25  ;;  %v744_v14 = vmax.f32 %v574_v32, 0.0 }
 0x18b   :  { %v747_v37 = vmax.f32 %v585_v15, 0.0 }
 0x18c   :  { %v745_v38 = vmax.f32 %v577_v35, 0.0 }
 0x18d   :  { %v1536_v39 = vpack.c.bf16 %v747_v37, %v746_v36  ;;  %1531 = vmatpush3.bf16.msra.mxu1 %v1970_v28 }
 0x18e   :  { %v1532_v40 = vpack.c.bf16 %v745_v38, %v744_v14  ;;  %v1438_v41 = vpop.f32.mrb[32].mxu0 }
 0x18f   :  { %v598_v44 = vadd.f32 %v1438_v41, %v1946_v49  ;;  %v589_v45 = vpop.f32.mrb[33].mxu0 }
 0x190   :  { %v590_v46 = vadd.f32 %v1946_v49, %v589_v45  ;;  %v1439_v48 = vpop.f32.mrb[34].mxu0  ;;  %1533 = vmatprep.subr.bf16.mxu1 %v1532_v40 }
 0x191   :  { %v601_v29 = vadd.f32 %v1439_v48, %v1946_v49  ;;  %v592_v50 = vpop.f32.mrb[35].mxu0  ;;  %1535 = vmatpush3.bf16.msra.mxu1 %v1980_v43  ;;  %v750_v52 = vmax.f32 %v598_v44, 0.0 }
 0x192   :  { %v593_v51 = vadd.f32 %v1946_v49, %v592_v50  ;;  %1537 = vmatprep.subr.bf16.mxu1 %v1536_v39  ;;  %v748_v28 = vmax.f32 %v590_v46, 0.0 }
 0x193   :  { %v751_v53 = vmax.f32 %v601_v29, 0.0 }
 0x194   :  { %v749_v54 = vmax.f32 %v593_v51, 0.0 }
 0x195   :  { %v2009_v55 = vpack.c.bf16 %v751_v53, %v750_v52  ;;  %1539 = vmatpush3.bf16.msra.mxu1 %v1978_v42 }
 0x196   :  { %v2014_v57 = vpack.c.bf16 %v749_v54, %v748_v28  ;;  %v1442_v58 = vpop.f32.mrb[36].mxu0 }
 0x197   :  { %v614_v59 = vadd.f32 %v1442_v58, %v1946_v49  ;;  %v605_v43 = vpop.f32.mrb[37].mxu0 }
 0x198   :  { %v606_v60 = vadd.f32 %v1946_v49, %v605_v43  ;;  %v1443_v62 = vpop.f32.mrb[38].mxu0  ;;  %868 = vmatmul.mubr.f32.vlgmr.msra.gmra.mrb[0].mxu1 %v1939_v47 }
 0x199   :  { %v617_v63 = vadd.f32 %v1443_v62, %v1946_v49  ;;  %v608_v1 = vpop.f32.mrb[39].mxu0  ;;  %937 = vmatprep.mubr.f32.mxu1 %v798_v56  ;;  %v754_v3 = vmax.f32 %v614_v59, 0.0 }
 0x19a   :  { %v609_v42 = vadd.f32 %v1946_v49, %v608_v1  ;;  %v752_v5 = vmax.f32 %v606_v60, 0.0 }
 0x19b   :  { %v755_v4 = vmax.f32 %v617_v63, 0.0 }
 0x19c   :  { %v753_v6 = vmax.f32 %v609_v42, 0.0 }
 0x19d   :  { %v2021_v7 = vpack.c.bf16 %v755_v4, %v754_v3 }
 0x19e   :  { %v2023_v8 = vpack.c.bf16 %v753_v6, %v752_v5  ;;  %v1446_v9 = vpop.f32.mrb[40].mxu0 }
 0x19f   :  { %v630_v10 = vadd.f32 %v1446_v9, %v1946_v49  ;;  %v621_v11 = vpop.f32.mrb[41].mxu0 }
 0x1a0   :  { %v622_v47 = vadd.f32 %v1946_v49, %v621_v11  ;;  %v1447_v12 = vpop.f32.mrb[42].mxu0 }
 0x1a1   :  { %v633_v13 = vadd.f32 %v1447_v12, %v1946_v49  ;;  %v624_v16 = vpop.f32.mrb[43].mxu0  ;;  %v758_v18 = vmax.f32 %v630_v10, 0.0 }
 0x1a2   :  { %v625_v17 = vadd.f32 %v1946_v49, %v624_v16  ;;  %v756_v2 = vmax.f32 %v622_v47, 0.0 }
 0x1a3   :  { %v759_v19 = vmax.f32 %v633_v13, 0.0 }
 0x1a4   :  { %v757_v20 = vmax.f32 %v625_v17, 0.0 }
 0x1a5   :  { %v2029_v21 = vpack.c.bf16 %v759_v19, %v758_v18 }
 0x1a6   :  { %v2031_v22 = vpack.c.bf16 %v757_v20, %v756_v2  ;;  %v1450_v23 = vpop.f32.mrb[44].mxu0 }
 0x1a7   :  { %v646_v0 = vadd.f32 %v1450_v23, %v1946_v49  ;;  %v637_v24 = vpop.f32.mrb[45].mxu0 }
 0x1a8   :  { %v638_v25 = vadd.f32 %v1946_v49, %v637_v24  ;;  %v1451_v26 = vpop.f32.mrb[46].mxu0 }
 0x1a9   :  { %v649_v27 = vadd.f32 %v1451_v26, %v1946_v49  ;;  %v640_v30 = vpop.f32.mrb[47].mxu0  ;;  %v762_v32 = vmax.f32 %v646_v0, 0.0 }
 0x1aa   :  { %v641_v31 = vadd.f32 %v1946_v49, %v640_v30  ;;  %v760_v15 = vmax.f32 %v638_v25, 0.0 }
 0x1ab   :  { %v763_v33 = vmax.f32 %v649_v27, 0.0 }
 0x1ac   :  { %v761_v34 = vmax.f32 %v641_v31, 0.0 }
 0x1ad   :  { %v2037_v35 = vpack.c.bf16 %v763_v33, %v762_v32 }
 0x1ae   :  { %v2039_v36 = vpack.c.bf16 %v761_v34, %v760_v15  ;;  %v1454_v37 = vpop.f32.mrb[48].mxu0  ;;  %v1813_v15 = vmov 0.0   ;;  %v1627_v34 = vld [vmem:[#allocation8 + $0x10] sm:$0xff]  }
 0x1af   :  { %v662_v14 = vadd.f32 %v1454_v37, %v1946_v49  ;;  %v653_v38 = vpop.f32.mrb[49].mxu0  ;;  %v1629_v37 = vld [vmem:[#allocation8 + $0x20] sm:$0xff]  }
 0x1b0   :  { %v654_v39 = vadd.f32 %v1946_v49, %v653_v38  ;;  %v1455_v40 = vpop.f32.mrb[50].mxu0 }
 0x1b1   :  { %v665_v41 = vadd.f32 %v1455_v40, %v1946_v49  ;;  %v656_v44 = vpop.f32.mrb[51].mxu0  ;;  %v766_v46 = vmax.f32 %v662_v14, 0.0 }
 0x1b2   :  { %v657_v45 = vadd.f32 %v1946_v49, %v656_v44  ;;  %v764_v29 = vmax.f32 %v654_v39, 0.0 }
 0x1b3   :  { %v767_v48 = vmax.f32 %v665_v41, 0.0 }
 0x1b4   :  { %v765_v50 = vmax.f32 %v657_v45, 0.0 }
 0x1b5   :  { %v1544_v51 = vpack.c.bf16 %v767_v48, %v766_v46  ;;  %v1633_v46 = vld [vmem:[#allocation10] sm:$0xff]  }
 0x1b6   :  { %v1540_v52 = vpack.c.bf16 %v765_v50, %v764_v29  ;;  %v1458_v53 = vpop.f32.mrb[52].mxu0  ;;  %v1634_v29 = vld [vmem:[#allocation10 + $0x8] sm:$0xff]   ;;  %v1635_v50 = vld [vmem:[#allocation10 + $0x10] sm:$0xff]  }
 0x1b7   :  { %v678_v28 = vadd.f32 %v1458_v53, %v1946_v49  ;;  %v669_v54 = vpop.f32.mrb[53].mxu0  ;;  %v1638_v53 = vld [vmem:[#allocation10 + $0x28] sm:$0xff]  }
 0x1b8   :  { %v670_v56 = vadd.f32 %v1946_v49, %v669_v54  ;;  %v1459_v58 = vpop.f32.mrb[54].mxu0  ;;  %1541 = vmatprep.subr.bf16.mxu1 %v1540_v52  ;;  %v1637_v52 = vld [vmem:[#allocation10 + $0x20] sm:$0xff]   ;;  %v1640_v54 = vld [vmem:[#allocation10 + $0x38] sm:$0xff]  }
 0x1b9   :  { %v681_v59 = vadd.f32 %v1459_v58, %v1946_v49  ;;  %v672_v43 = vpop.f32.mrb[55].mxu0  ;;  %1543 = vmatpush3.bf16.msra.mxu1 %v2014_v57  ;;  %v770_v62 = vmax.f32 %v678_v28, 0.0  ;;  %v1639_v28 = vld [vmem:[#allocation10 + $0x30] sm:$0xff]  }
 0x1ba   :  { %v673_v60 = vadd.f32 %v1946_v49, %v672_v43  ;;  %1545 = vmatprep.subr.bf16.mxu1 %v1544_v51  ;;  %v768_v1 = vmax.f32 %v670_v56, 0.0  ;;  %v1636_v51 = vld [vmem:[#allocation10 + $0x18] sm:$0xff]  }
 0x1bb   :  { %v771_v63 = vmax.f32 %v681_v59, 0.0  ;;  %v1242_v56 = vld [vmem:[%s2101_s5] ss:$0 sm:$0xff] }
 0x1bc   :  { %v769_v42 = vmax.f32 %v673_v60, 0.0 }
 0x1bd   :  { %v1552_v3 = vpack.c.bf16 %v771_v63, %v770_v62  ;;  %1547 = vmatpush3.bf16.msra.mxu1 %v2009_v55 }
 0x1be   :  { %v1548_v4 = vpack.c.bf16 %v769_v42, %v768_v1  ;;  %v1462_v5 = vpop.f32.mrb[56].mxu0 }
 0x1bf   :  { %v694_v6 = vadd.f32 %v1462_v5, %v1946_v49  ;;  %v685_v9 = vpop.f32.mrb[57].mxu0 }
 0x1c0   :  { %v686_v10 = vadd.f32 %v1946_v49, %v685_v9  ;;  %v1463_v11 = vpop.f32.mrb[58].mxu0  ;;  %1549 = vmatprep.subr.bf16.mxu1 %v1548_v4 }
 0x1c1   :  { %v697_v57 = vadd.f32 %v1463_v11, %v1946_v49  ;;  %v688_v47 = vpop.f32.mrb[59].mxu0  ;;  %1551 = vmatpush3.bf16.msra.mxu1 %v2023_v8  ;;  %v774_v13 = vmax.f32 %v694_v6, 0.0 }
 0x1c2   :  { %v689_v12 = vadd.f32 %v1946_v49, %v688_v47  ;;  %1553 = vmatprep.subr.bf16.mxu1 %v1552_v3  ;;  %v772_v55 = vmax.f32 %v686_v10, 0.0 }
 0x1c3   :  { %v775_v16 = vmax.f32 %v697_v57, 0.0 }
 0x1c4   :  { %v773_v17 = vmax.f32 %v689_v12, 0.0 }
 0x1c5   :  { %v1560_v18 = vpack.c.bf16 %v775_v16, %v774_v13  ;;  %1555 = vmatpush3.bf16.msra.mxu1 %v2021_v7 }
 0x1c6   :  { %v1556_v19 = vpack.c.bf16 %v773_v17, %v772_v55  ;;  %v1466_v2 = vpop.f32.mrb[60].mxu0 }
 0x1c7   :  { %v710_v20 = vadd.f32 %v1466_v2, %v1946_v49  ;;  %v701_v23 = vpop.f32.mrb[61].mxu0 }
 0x1c8   :  { %v702_v0 = vadd.f32 %v1946_v49, %v701_v23  ;;  %v1467_v24 = vpop.f32.mrb[62].mxu0  ;;  %1557 = vmatprep.subr.bf16.mxu1 %v1556_v19 }
 0x1c9   :  { %v713_v8 = vadd.f32 %v1467_v24, %v1946_v49  ;;  %v704_v25 = vpop.f32.mrb[63].mxu0  ;;  %1559 = vmatpush3.bf16.msra.mxu1 %v2031_v22  ;;  %v778_v27 = vmax.f32 %v710_v20, 0.0  ;;  %v1625_v22 = vld [vmem:[#allocation8] sm:$0xff]  }
 0x1ca   :  { %v705_v26 = vadd.f32 %v1946_v49, %v704_v25  ;;  %1561 = vmatprep.subr.bf16.mxu1 %v1560_v18  ;;  %v776_v7 = vmax.f32 %v702_v0, 0.0  ;;  %v1626_v49 = vld [vmem:[#allocation8 + $0x8] sm:$0xff]  }
 0x1cb   :  { %v779_v30 = vmax.f32 %v713_v8, 0.0 }
 0x1cc   :  { %v777_v31 = vmax.f32 %v705_v26, 0.0 }
 0x1cd   :  { %v1568_v32 = vpack.c.bf16 %v779_v30, %v778_v27  ;;  %1563 = vmatpush3.bf16.msra.mxu1 %v2029_v21  ;;  %v1628_v21 = vld [vmem:[#allocation8 + $0x18] sm:$0xff]  }
 0x1ce   :  { %v1564_v33 = vpack.c.bf16 %v777_v31, %v776_v7 }
 0x1d0   :  { %1565 = vmatprep.subr.bf16.mxu1 %v1564_v33 }
 0x1d1   :  { %1567 = vmatpush3.bf16.msra.mxu1 %v2039_v36  ;;  %v1630_v36 = vld [vmem:[#allocation8 + $0x28] sm:$0xff]  }
 0x1d2   :  { %1569 = vmatprep.subr.bf16.mxu1 %v1568_v32 }
 0x1d5   :  { %1571 = vmatpush3.bf16.msra.mxu1 %v2037_v35  ;;  %v1632_v35 = vld [vmem:[#allocation8 + $0x38] sm:$0xff]  }
 0x1d6   :  { %1468 = vmatprep.subr.bf16.mxu1 %v1813_v15 }
 0x1d8   :  { %938 = vmatmul.mubr.f32.vlgmr.msra.gmra.mrb[2].mxu1 %v1952_v61  ;;  %v1631_v61 = vld [vmem:[#allocation8 + $0x30] sm:$0xff]  }
 0x1d9   :  { %1469 = vmatpush3.bf16.msra.mxu1 %v1625_v22  ;;  %1484 = vmatprep.mubr.msk.bf16.mxu1 %vm1814_vm0, %v1813_v15 }
 0x1da   :  { %1470 = vmatprep.subr.bf16.mxu1 %v1813_v15 }
 0x1dd   :  { %1471 = vmatpush3.bf16.msra.mxu1 %v1626_v49 }
 0x1de   :  { %1472 = vmatprep.subr.bf16.mxu1 %v1813_v15 }
 0x1e1   :  { %1473 = vmatpush3.bf16.msra.mxu1 %v1627_v34 }
 0x1e2   :  { %1474 = vmatprep.subr.bf16.mxu1 %v1813_v15 }
 0x1e5   :  { %1475 = vmatpush3.bf16.msra.mxu1 %v1628_v21 }
 0x1e6   :  { %1476 = vmatprep.subr.bf16.mxu1 %v1813_v15 }
 0x1e9   :  { %1477 = vmatpush3.bf16.msra.mxu1 %v1629_v37 }
 0x1ea   :  { %1478 = vmatprep.subr.bf16.mxu1 %v1813_v15 }
 0x1ed   :  { %1479 = vmatpush3.bf16.msra.mxu1 %v1630_v36 }
 0x1ee   :  { %1480 = vmatprep.subr.bf16.mxu1 %v1813_v15 }
 0x1f1   :  { %1481 = vmatpush3.bf16.msra.mxu1 %v1631_v61 }
 0x1f2   :  { %1482 = vmatprep.subr.bf16.mxu1 %v1813_v15 }
 0x1f5   :  { %1483 = vmatpush3.bf16.msra.mxu1 %v1632_v35 }
 0x1f6   :  { %1488 = vmatprep.subr.bf16.mxu1 %v1813_v15 }
 0x26b   :  { %v1332_v14 = vpop.f32.mrb[0].mxu1 }
 0x26c   :  { %v1333_v38 = vpop.f32.mrb[1].mxu1 }
 0x26d   :  { %v1334_v39 = vadd.f32 %v1333_v38, %v1332_v14 }
 0x2ab   :  { %v1367_v40 = vpop.f32.mrb[2].mxu1 }
 0x2ac   :  { %v1368_v41 = vpop.f32.mrb[3].mxu1 }
 0x2ad   :  { %v1369_v44 = vadd.f32 %v1368_v41, %v1367_v40 }
 0x2af   :  { %v940_v45 = vadd.f32 %v1369_v44, %v1334_v39 }
 0x2b1   :  { %v943_v48 = vpack.c.bf16 %v940_v45, %v940_v45 }
 0x2b3   :  { %1485 = vmatmul.mubr.bf16.vlgmr.msra.gmra.mrb[4].mxu1 %v943_v48 }
 0x2b4   :  { %1489 = vmatpush3.bf16.msra.mxu1 %v1633_v46  ;;  %1504 = vmatprep.mubr.msk.bf16.mxu1 %vm1814_vm0, %v1813_v15 }
 0x2b5   :  { %1490 = vmatprep.subr.bf16.mxu1 %v1813_v15 }
 0x2b8   :  { %1491 = vmatpush3.bf16.msra.mxu1 %v1634_v29 }
 0x2b9   :  { %1492 = vmatprep.subr.bf16.mxu1 %v1813_v15 }
 0x2bc   :  { %1493 = vmatpush3.bf16.msra.mxu1 %v1635_v50 }
 0x2bd   :  { %1494 = vmatprep.subr.bf16.mxu1 %v1813_v15 }
 0x2c0   :  { %1495 = vmatpush3.bf16.msra.mxu1 %v1636_v51 }
 0x2c1   :  { %1496 = vmatprep.subr.bf16.mxu1 %v1813_v15 }
 0x2c4   :  { %1497 = vmatpush3.bf16.msra.mxu1 %v1637_v52 }
 0x2c5   :  { %1498 = vmatprep.subr.bf16.mxu1 %v1813_v15 }
 0x2c8   :  { %1499 = vmatpush3.bf16.msra.mxu1 %v1638_v53 }
 0x2c9   :  { %1500 = vmatprep.subr.bf16.mxu1 %v1813_v15 }
 0x2cc   :  { %1501 = vmatpush3.bf16.msra.mxu1 %v1639_v28 }
 0x2cd   :  { %1502 = vmatprep.subr.bf16.mxu1 %v1813_v15 }
 0x2d0   :  { %1503 = vmatpush3.bf16.msra.mxu1 %v1640_v54 }
 0x386   :  { %v1049_v58 = vpop.f32.mrb[4].mxu1 }
 0x387   :  { %v1050_v59 = vadd.f32 %v1242_v56, %v1049_v58  ;;  %v1486_v43 = vpop.f32.mrb[5].mxu1 }
 0x388   :  { %v1052_v60 = vpop.f32.mrb[6].mxu1 }
 0x389   :  { %v1055_v62 = vmax.f32 %v1050_v59, 0.0  ;;  %v1487_v63 = vpop.f32.mrb[7].mxu1 }
 0x38b   :  { %v1057_v1 = vpack.c.bf16 %v1055_v62, %v1055_v62  ;;  %1056 = vst [vmem:[#allocation12] sm:$0x3] %v1055_v62 }
 0x38d   :  { %1505 = vmatmul.mubr.bf16.vlgmr.msra.gmra.mrb[8].mxu1 %v1057_v1 }
 0x38e   :  { %1762 = shalt.err (!%p1759_p2)
}
 0x38f   :  { %s1763_s30 = scalar_lea.hbm %s2105_s9, 32 }
 0x390   :  { %p1764_p3 = scmp.ne.s32.totalorder %s2105_s9, %s1763_s30  ;;  %p1767_p4 = scmp.lt.u32.totalorder %s1763_s30, %s2105_s9 }
 0x392   :  { %p1769_p5 = pnand %p1767_p4, %p1764_p3 }
 0x394   :  { %1772 = shalt.err (!%p1769_p5)
}
 0x395   :  { %1189 = dma.vmem_to_hbm [thread:$0]  %s1187_s27, 32, %s2105_s9, [#allocation13]   ;;  %v1251_v42 = vld [vmem:[%s2103_s7] ss:$0 sm:$0xff] }
 0x396   :  { %s1816_s17 = smov [#allocation11]  }
 0x397   :  { %s1176_s18 = sshll.u32 %s1816_s17, 4  ;;  %s1177_s18 = int_to_ptr.vmem [resolvable:$true] %s1176_s18 }
 0x398   :  { %s1773_s19 = scalar_lea.vmem %s1177_s18, 32  ;;  %p1778_p7 = scmp.lt.s32.totalorder %s1177_s18, %s1177_s18 }
 0x399   :  { %p1774_p6 = scmp.ne.s32.totalorder %s1177_s18, %s1773_s19  ;;  %p1779_p8 = scmp.lt.s32.totalorder %s1773_s19, %s1773_s19 }
 0x39b   :  { %p1780_p9 = por %p1779_p8, %p1778_p7 }
 0x39d   :  { %p1781_p10 = pnand %p1780_p9, %p1774_p6 }
 0x460   :  { %v1163_v3 = vpop.f32.mrb[8].mxu1 }
 0x461   :  { %v1164_v4 = vadd.f32 %v1251_v42, %v1163_v3  ;;  %v1506_v5 = vpop.f32.mrb[9].mxu1 }
 0x462   :  { %v1166_v6 = vpop.f32.mrb[10].mxu1 }
 0x463   :  { %1169 = vst [vmem:[#allocation11] sm:$0x3] %v1164_v4  ;;  %v1507_v9 = vpop.f32.mrb[11].mxu1 }
 0x464   :  { %1784 = shalt.err (!%p1781_p10)
}
 0x465   :  { %s1785_s7 = scalar_lea.hbm %s2104_s8, 32 }
 0x466   :  { %p1786_p11 = scmp.ne.s32.totalorder %s2104_s8, %s1785_s7  ;;  %p1789_p12 = scmp.lt.u32.totalorder %s1785_s7, %s2104_s8 }
 0x468   :  { %p1791_p13 = pnand %p1789_p12, %p1786_p11 }
 0x46a   :  { %1794 = shalt.err (!%p1791_p13)
}
 0x46b   :  { %1179 = dma.vmem_to_hbm [thread:$0]  %s1177_s18, 32, %s2104_s8, [#allocation4]  }
 0x46c   :  { %1801 = dma.done.wait [#allocation4], 32  }
 0x46d   :  { %1802 = vsyncadd [#allocation4], 4294967264 }
 0x46e   :  { %1803 = dma.done.wait [#allocation13], 32  }
 0x46f   :  { %1804 = vsyncadd [#allocation13], 4294967264 }
 0x470   :  { %1196 = vsyncpa [#allocation3], 1 }
 0x471   :  { %1197 = vsyncpa [#allocation6], 1 }
 0x472   :  { %1198 = vsyncpa [#allocation9], 1 }
 0x473   :  { %1199 = vsyncpa [#allocation4], 1 }
 0x474   :  { %1200 = vsyncpa [#allocation13], 1 }

</bundles_post_ra>
